<compile_context>
chip_gen: v7x
topology: tpu7x:2x2x1
jax: 0.10.0
libtpu: 0.0.40
codegen_flags: <defaults>
</compile_context>

<pallas_src>
import functools
import math

import jax
import jax.numpy as jnp
from jax import lax
from jax.experimental import pallas as pl
from jax.experimental.pallas import tpu as pltpu

_LANE = 512        # lane-axis width of the flattened slab (multiple of 128)
_MAX_TILE_R = 512  # sublane rows per block -> 512*512*4B = 1 MiB f32 per input


def _bce_smooth(pred, tgt, eps):
    """Elementwise BCE with clipped predictions (f32 math inside the kernel)."""
    p = pred.astype(jnp.float32)
    t = tgt.astype(jnp.float32)
    # min/max clip (2 VALU ops). NOTE: differs from the PyTorch masking form
    # only for NaN predictions (masking maps NaN -> 0 -> log(eps) after clip).
    r = jnp.minimum(jnp.maximum(p, jnp.float32(eps)), jnp.float32(1.0 - eps))
    return -t * jnp.log(r) - (1.0 - t) * jnp.log(1.0 - r)


def _bce_elementwise_kernel(pred_ref, tgt_ref, out_ref, *, eps):
    out_ref[...] = _bce_smooth(pred_ref[...], tgt_ref[...], eps)


def _bce_partial_sum_kernel(pred_ref, tgt_ref, out_ref, *, eps, valid,
                            padded_total):
    loss = _bce_smooth(pred_ref[...], tgt_ref[...], eps)
    tile_r, lane = loss.shape
    if valid < padded_total:
        # Static branch: mask padded tail.  int32 flat index is fine for
        # < 2**31 elements, plenty for an image-loss tensor.
        row0 = pl.program_id(0) * tile_r
        rows = lax.broadcasted_iota(jnp.int32, (tile_r, lane), 0) + row0
        cols = lax.broadcasted_iota(jnp.int32, (tile_r, lane), 1)
        loss = jnp.where(rows * lane + cols < valid, loss, 0.0)
    # One cross-sublane reduce per block; the cross-lane reduce is deferred to
    # a tiny jnp.sum in the wrapper (keeps per-step work off the scalar path).
    out_ref[...] = jnp.sum(loss, axis=0, keepdims=True)


def _layout(total):
    """Return (rows_padded, tile_r, num_blocks) for the (rows, _LANE) slab."""
    rows = pl.cdiv(total, _LANE)
    if rows <= _MAX_TILE_R:
        # Single block; block_shape equals the full array dims, so no (8,128)
        # divisibility requirement and no row padding.
        return rows, rows, 1
    num_blocks = pl.cdiv(rows, _MAX_TILE_R)
    tile_r = pl.cdiv(rows, num_blocks)
    tile_r = pl.cdiv(tile_r, 8) * 8           # sublane-aligned
    rows_padded = num_blocks * tile_r         # minimal row padding
    return rows_padded, tile_r, num_blocks


def bce_smooth_loss(predict, target, reduce=None, epsilon=1e-07):
    assert predict.shape == target.shape
    if reduce not in (None, "mean", "sum"):
        raise ValueError(f"unknown reduce mode: {reduce}")

    orig_shape = predict.shape
    total = math.prod(orig_shape)
    rows_padded, tile_r, num_blocks = _layout(total)
    padded_total = rows_padded * _LANE

    # Flatten (reshape is layout glue); keep original dtype — cast is in-kernel.
    pred_flat = predict.reshape(-1)
    tgt_flat = target.reshape(-1)
    if padded_total != total:
        pad = padded_total - total
        pred_flat = jnp.pad(pred_flat, (0, pad))
        tgt_flat = jnp.pad(tgt_flat, (0, pad))
    pred2d = pred_flat.reshape(rows_padded, _LANE)
    tgt2d = tgt_flat.reshape(rows_padded, _LANE)

    in_specs = [
        pl.BlockSpec((tile_r, _LANE), lambda i: (i, 0)),
        pl.BlockSpec((tile_r, _LANE), lambda i: (i, 0)),
    ]

    if reduce is None:
        out = pl.pallas_call(
            functools.partial(_bce_elementwise_kernel, eps=epsilon),
            out_shape=jax.ShapeDtypeStruct((rows_padded, _LANE), jnp.float32),
            grid_spec=pltpu.PrefetchScalarGridSpec(
                num_scalar_prefetch=0,
                grid=(num_blocks,),
                in_specs=in_specs,
                out_specs=pl.BlockSpec((tile_r, _LANE), lambda i: (i, 0)),
            ),
            compiler_params=pltpu.CompilerParams(
                dimension_semantics=("parallel",)
            ),
        )(pred2d, tgt2d)
        return out.reshape(-1)[:total].reshape(orig_shape)

    # Per-block lane partials, fully parallel grid; finish with a tiny jnp.sum.
    partials = pl.pallas_call(
        functools.partial(
            _bce_partial_sum_kernel,
            eps=epsilon,
            valid=total,
            padded_total=padded_total,
        ),
        out_shape=jax.ShapeDtypeStruct((1, num_blocks * _LANE), jnp.float32),
        grid_spec=pltpu.PrefetchScalarGridSpec(
            num_scalar_prefetch=0,
            grid=(num_blocks,),
            in_specs=in_specs,
            out_specs=pl.BlockSpec((1, _LANE), lambda i: (0, i)),
        ),
        compiler_params=pltpu.CompilerParams(
            dimension_semantics=("parallel",)
        ),
    )(pred2d, tgt2d)

    total_sum = jnp.sum(partials)
    if reduce == "mean":
        return total_sum / jnp.float32(total)
    return total_sum


# ----------------------------- reference ------------------------------------


def _reference(predict, target, reduce=None, epsilon=1e-07):
    p = predict.astype(jnp.float32)
    t = target.astype(jnp.float32)
    r = jnp.clip(p, epsilon, 1.0 - epsilon)
    loss = -t * jnp.log(r) - (1.0 - t) * jnp.log(1.0 - r)
    if reduce == "mean":
        return jnp.mean(loss)
    if reduce == "sum":
        return jnp.sum(loss)
    return loss


if __name__ == "__main__":
    key = jax.random.PRNGKey(0)
    ok = True
    # (2,4,16,16): divides evenly (no padding); (2,3,13,13): ragged tail
    # exercising the pad + in-kernel mask path.
    cases = [((2, 4, 16, 16), jnp.float32),
             ((2, 3, 13, 13), jnp.float32),
             ((2, 4, 16, 16), jnp.bfloat16)]
    for shape, dtype in cases:
        k1, k2, key = jax.random.split(key, 3)
        predict = jax.random.uniform(k1, shape, dtype=jnp.float32).astype(dtype)
        target = (jax.random.uniform(k2, shape, dtype=jnp.float32) > 0.5).astype(
            dtype
        )
        for mode in (None, "mean", "sum"):
            out = jax.block_until_ready(
                bce_smooth_loss(predict, target, reduce=mode, epsilon=1e-07)
            )
            ref = _reference(predict, target, reduce=mode, epsilon=1e-07)
            if not jnp.allclose(out, ref, rtol=1e-5, atol=1e-5):
                ok = False
                print(f"MISMATCH shape={shape} dtype={dtype} reduce={mode}")

    if ok:
        print("KERNEL_OK")
</pallas_src>

<mosaic_0001>
module attributes {stable_mosaic.version = 11 : i64} {
  func.func @_bce_elementwise_kernel(%arg0: i32, %arg1: memref<4x512xf32, #tpu.memory_space<vmem>>, %arg2: memref<4x512xf32, #tpu.memory_space<vmem>>, %arg3: memref<4x512xf32, #tpu.memory_space<vmem>>) attributes {dimension_semantics = [#tpu.dimension_semantics<parallel>], iteration_bounds = array<i64: 1>, scalar_prefetch = 0 : i64, scratch_operands = 0 : i64, tpu.core_type = #tpu.core_type<tc>, window_params = [{transform_indices = @transform_0, window_bounds = array<i64: 4, 512>}, {transform_indices = @transform_1, window_bounds = array<i64: 4, 512>}, {transform_indices = @transform_2, window_bounds = array<i64: 4, 512>}]} {
    %c0 = arith.constant 0 : index
    %c0_0 = arith.constant 0 : index
    %0 = vector.load %arg1[%c0, %c0_0] : memref<4x512xf32, #tpu.memory_space<vmem>>, vector<4x512xf32>
    %c0_1 = arith.constant 0 : index
    %c0_2 = arith.constant 0 : index
    %1 = vector.load %arg2[%c0_1, %c0_2] : memref<4x512xf32, #tpu.memory_space<vmem>>, vector<4x512xf32>
    %cst = arith.constant 1.000000e-07 : f32
    %2 = vector.broadcast %cst : f32 to vector<4x512xf32>
    %3 = arith.maximumf %0, %2 : vector<4x512xf32>
    %cst_3 = arith.constant 0.99999988 : f32
    %4 = vector.broadcast %cst_3 : f32 to vector<4x512xf32>
    %5 = arith.minimumf %3, %4 : vector<4x512xf32>
    %cst_4 = arith.constant 0.000000e+00 : f32
    %6 = vector.broadcast %cst_4 : f32 to vector<4x512xf32>
    %7 = arith.subf %6, %1 : vector<4x512xf32>
    %8 = math.log %5 : vector<4x512xf32>
    %9 = arith.mulf %7, %8 : vector<4x512xf32>
    %cst_5 = arith.constant 1.000000e+00 : f32
    %10 = vector.broadcast %cst_5 : f32 to vector<4x512xf32>
    %11 = arith.subf %10, %1 : vector<4x512xf32>
    %cst_6 = arith.constant 1.000000e+00 : f32
    %12 = vector.broadcast %cst_6 : f32 to vector<4x512xf32>
    %13 = arith.subf %12, %5 : vector<4x512xf32>
    %14 = math.log %13 : vector<4x512xf32>
    %15 = arith.mulf %11, %14 : vector<4x512xf32>
    %16 = arith.subf %9, %15 : vector<4x512xf32>
    %c0_7 = arith.constant 0 : index
    %c0_8 = arith.constant 0 : index
    %17 = vector.load %arg3[%c0_7, %c0_8] : memref<4x512xf32, #tpu.memory_space<vmem>>, vector<4x512xf32>
    tpu.vector_store %arg3[%c0_7, %c0_8], %16 {strides = array<i32>} : memref<4x512xf32, #tpu.memory_space<vmem>>, vector<4x512xf32>,
    return
  }
  func.func @transform_0(%arg0: i32) -> (i32, i32) {
    %c0_i32 = arith.constant 0 : i32
    %c0_i32_0 = arith.constant 0 : i32
    return %arg0, %c0_i32 : i32, i32
  }
  func.func @transform_1(%arg0: i32) -> (i32, i32) {
    %c0_i32 = arith.constant 0 : i32
    %c0_i32_0 = arith.constant 0 : i32
    return %arg0, %c0_i32 : i32, i32
  }
  func.func @transform_2(%arg0: i32) -> (i32, i32) {
    %c0_i32 = arith.constant 0 : i32
    %c0_i32_0 = arith.constant 0 : i32
    return %arg0, %c0_i32 : i32, i32
  }
}

</mosaic_0001>

<bundles_post_ra>
// kernel: tpu_custom_call.1
= control target key start
LH: loop header
LB: loop body
LE: loop exit
PB: predicated region body
PF: predicated region fallthrough
CT: control target
= control target key end

     0   :  { %7 = vsyncpa [#allocation3], 0  ;;  %s219_s0 = inlined_call_operand.hbm [shape: f32[4,512], index: 0, kind: input, shape index: {}]   ;;  %s220_s1 = inlined_call_operand.hbm [shape: f32[4,512], index: 1, kind: input, shape index: {}]   ;;  %s221_s2 = inlined_call_operand.hbm [shape: f32[4,512], index: 2, kind: output, shape index: {}]  }
   0x1   :  { %8 = vsyncpa [#allocation6], 0 }
   0x2   :  { %9 = vsyncpa [#allocation4], 0  ;;  %s165_s9 = smov [#allocation2]   ;;  %s166_s11 = smov [#allocation5]  }
   0x3   :  { %s16_s10 = sshll.u32 %s165_s9, 4  ;;  %s26_s12 = sshll.u32 %s166_s11, 4  ;;  %s17_s10 = int_to_ptr.vmem [resolvable:$true] %s16_s10  ;;  %s27_s12 = int_to_ptr.vmem [resolvable:$true] %s26_s12 }
   0x4   :  { %s93_s15 = scalar_lea.hbm %s219_s0, 256 }
   0x5   :  { %p94_p0 = scmp.ne.s32.totalorder %s219_s0, %s93_s15  ;;  %p97_p1 = scmp.lt.u32.totalorder %s93_s15, %s219_s0 }
   0x7   :  { %p99_p2 = pnand %p97_p1, %p94_p0 }
   0x9   :  { %102 = shalt.err (!%p99_p2)
}
   0xa   :  { %s103_s20 = scalar_lea.vmem %s17_s10, 256  ;;  %p108_p4 = scmp.lt.s32.totalorder %s17_s10, %s17_s10 }
   0xb   :  { %p104_p3 = scmp.ne.s32.totalorder %s17_s10, %s103_s20  ;;  %p109_p5 = scmp.lt.s32.totalorder %s103_s20, %s103_s20 }
   0xd   :  { %p110_p6 = por %p109_p5, %p108_p4 }
   0xf   :  { %p111_p7 = pnand %p110_p6, %p104_p3 }
  0x11   :  { %114 = shalt.err (!%p111_p7)
}
  0x12   :  { %19 = dma.hbm_to_vmem [thread:$0]  %s219_s0, 256, %s17_s10, [#allocation3]  }
  0x13   :  { %s115_s25 = scalar_lea.hbm %s220_s1, 256 }
  0x14   :  { %p116_p8 = scmp.ne.s32.totalorder %s220_s1, %s115_s25  ;;  %p119_p9 = scmp.lt.u32.totalorder %s115_s25, %s220_s1 }
  0x16   :  { %p121_p10 = pnand %p119_p9, %p116_p8 }
  0x18   :  { %124 = shalt.err (!%p121_p10)
}
  0x19   :  { %s125_s30 = scalar_lea.vmem %s27_s12, 256  ;;  %p130_p12 = scmp.lt.s32.totalorder %s27_s12, %s27_s12 }
  0x1a   :  { %p126_p11 = scmp.ne.s32.totalorder %s27_s12, %s125_s30  ;;  %p131_p13 = scmp.lt.s32.totalorder %s125_s30, %s125_s30 }
  0x1c   :  { %p132_p0 = por %p131_p13, %p130_p12 }
  0x1e   :  { %p133_p1 = pnand %p132_p0, %p126_p11 }
  0x20   :  { %136 = shalt.err (!%p133_p1)
}
  0x21   :  { %29 = dma.hbm_to_vmem [thread:$0]  %s220_s1, 256, %s27_s12, [#allocation6]  }
  0x22   :  { %159 = dma.done.wait [#allocation3], 256  }
  0x23   :  { %160 = vsyncadd [#allocation3], 4294967040 }
  0x24   :  { %161 = dma.done.wait [#allocation6], 256  }
  0x25   :  { %162 = vsyncadd [#allocation6], 4294967040  ;;  %v36_v0 = vld [vmem:[#allocation2] sm:$0xff]  ;;  %v37_v1 = vld [vmem:[#allocation2 + $0x8] sm:$0xff]  ;;  %s167_s1 = smov [#allocation7]  }
  0x26   :  { %v40_v2 = vmax.f32 %v36_v0, 1e-07  ;;  %v41_v3 = vmax.f32 %v37_v1, 1e-07  ;;  %v38_v8 = vld [vmem:[#allocation5] sm:$0xff]  ;;  %v39_v9 = vld [vmem:[#allocation5 + $0x8] sm:$0xff] }
  0x27   :  { %v44_v10 = vsub.f32 0.0, %v38_v8  ;;  %v45_v12 = vsub.f32 0.0, %v39_v9  ;;  %v52_v15 = vsub.f32 1.0, %v38_v8  ;;  %v53_v18 = vsub.f32 1.0, %v39_v9  ;;  %s72_s4 = sshll.u32 %s167_s1, 4  ;;  %s73_s4 = int_to_ptr.vmem [resolvable:$true] %s72_s4 }
  0x28   :  { %v42_v4 = vmin.f32 %v40_v2, 0.9999999  ;;  %v43_v5 = vmin.f32 %v41_v3, 0.9999999  ;;  %s137_s5 = scalar_lea.vmem %s73_s4, 256  ;;  %p142_p3 = scmp.lt.s32.totalorder %s73_s4, %s73_s4 }
  0x29   :  { %p138_p2 = scmp.ne.s32.totalorder %s73_s4, %s137_s5  ;;  %p143_p4 = scmp.lt.s32.totalorder %s137_s5, %s137_s5 }
  0x2a   :  { %85 = vlog2.f32 %v42_v4  ;;  %v54_v6 = vsub.f32 1.0, %v42_v4  ;;  %v55_v7 = vsub.f32 1.0, %v43_v5 }
  0x2b   :  { %87 = vlog2.f32 %v43_v5  ;;  %p144_p5 = por %p143_p4, %p142_p3 }
  0x2c   :  { %89 = vlog2.f32 %v54_v6 }
  0x2d   :  { %91 = vlog2.f32 %v55_v7  ;;  %p145_p6 = pnand %p144_p5, %p138_p2 }
  0x34   :  { %v86_v11 = vpop.eup %85 }
  0x35   :  { %v88_v13 = vpop.eup %87  ;;  %v47_v14 = vmul.f32 0.6931472, %v86_v11 }
  0x36   :  { %v90_v16 = vpop.eup %89  ;;  %v49_v17 = vmul.f32 0.6931472, %v88_v13 }
  0x37   :  { %v92_v19 = vpop.eup %91  ;;  %v50_v20 = vmul.f32 %v47_v14, %v44_v10  ;;  %v57_v21 = vmul.f32 0.6931472, %v90_v16 }
  0x38   :  { %v51_v22 = vmul.f32 %v49_v17, %v45_v12  ;;  %v59_v23 = vmul.f32 0.6931472, %v92_v19 }
  0x39   :  { %v60_v24 = vmul.f32 %v57_v21, %v52_v15 }
  0x3a   :  { %v61_v25 = vmul.f32 %v59_v23, %v53_v18 }
  0x3b   :  { %v62_v26 = vsub.f32 %v50_v20, %v60_v24 }
  0x3c   :  { %v63_v27 = vsub.f32 %v51_v22, %v61_v25 }
  0x3d   :  { %64 = vst [vmem:[#allocation7] sm:$0xff] %v62_v26 }
  0x3e   :  { %65 = vst [vmem:[#allocation7 + $0x8] sm:$0xff] %v63_v27 }
  0x3f   :  { %148 = shalt.err (!%p145_p6)
}
  0x40   :  { %s149_s8 = scalar_lea.hbm %s221_s2, 256 }
  0x41   :  { %p150_p7 = scmp.ne.s32.totalorder %s221_s2, %s149_s8  ;;  %p153_p8 = scmp.lt.u32.totalorder %s149_s8, %s221_s2 }
  0x43   :  { %p155_p9 = pnand %p153_p8, %p150_p7 }
  0x45   :  { %158 = shalt.err (!%p155_p9)
}
  0x46   :  { %75 = dma.vmem_to_hbm [thread:$0]  %s73_s4, 256, %s221_s2, [#allocation4]  }
  0x47   :  { %163 = dma.done.wait [#allocation4], 256  }
  0x48   :  { %164 = vsyncadd [#allocation4], 4294967040 }
  0x49   :  { %79 = vsyncpa [#allocation3], 1 }
  0x4a   :  { %80 = vsyncpa [#allocation6], 1 }
  0x4b   :  { %81 = vsyncpa [#allocation4], 1 }

</bundles_post_ra>
